<compile_context>
chip_gen: v6e
topology: v6e:2x2x1
jax: 0.10.0
libtpu: 0.0.40
codegen_flags: <defaults>
</compile_context>

<pallas_src>
import functools
import warnings

import jax
import jax.numpy as jnp
from jax.experimental import pallas as pl
from jax.experimental.pallas import tpu as pltpu


def _logreg_kernel(x_ref, w_ref, b_ref, o_ref):
    # x_ref: (tb, pack*F)      streamed batch tile (bf16 preferred)
    # w_ref: (pack*F, pack*C)  resident block-diagonal weight (bf16)
    # b_ref: (1, pack*C)       resident tiled bias (f32)
    # MXU matmul with f32 accumulation; bias-add + sigmoid on VPU/EUP.
    logits = jnp.dot(x_ref[...], w_ref[...], preferred_element_type=jnp.float32)
    o_ref[...] = jax.nn.sigmoid(logits + b_ref[...]).astype(o_ref.dtype)


def pack_params(weight, bias, *, param_dtype=jnp.bfloat16,
                max_packed_weight_bytes=4 * 2**20):
    """One-time (parameter-load-time) transform of PyTorch-layout params.

    weight: (C, F) as in nn.Linear; bias: (C,).
    Returns (w_packed, b_packed) where
      w_packed: (pack*F, pack*C) block-diagonal replication of weight.T,
                cast once to `param_dtype` (bf16 by default).
      b_packed: (1, pack*C) tiled bias, kept f32 (added post-accumulation).
    """
    C, F = weight.shape
    pack = 128 // C if (C < 128 and 128 % C == 0) else 1
    itemsize = jnp.dtype(param_dtype).itemsize
    if pack > 1 and (pack * F) * (pack * C) * itemsize > max_packed_weight_bytes:
        pack = 1
    if pack == 1 and C < 128:
        warnings.warn(
            "pack fell back to 1 (output lanes < 128): numerically correct "
            "but output stores are lane-masked and slower.")
    w = weight.T.astype(param_dtype)                 # transpose ONCE, not per call
    b = bias.astype(jnp.float32)
    if pack > 1:
        # Block-diagonal: column block j applies W to packed example slot j.
        w = jnp.kron(jnp.eye(pack, dtype=w.dtype), w)   # (pack*F, pack*C)
        b = jnp.tile(b, pack)
    return w, b.reshape(1, -1)


def _round_up(v, m):
    return ((v + m - 1) // m) * m


@functools.partial(jax.jit, static_argnames=("n_classes", "block_rows"))
def logistic_regression_forward(x, w_packed, b_packed, *, n_classes,
                                block_rows=1024):
    """x: (B, F) bf16 (preferred) or f32. Returns f32 sigmoid(x @ W.T + b)."""
    B, F = x.shape
    pF, pC = w_packed.shape
    pack = pC // n_classes
    assert pF == pack * F and pC == pack * n_classes

    # NOTE: x is streamed in the dtype it arrives in.  For best HBM
    # throughput the producer should already emit bf16 (a wrapper-side
    # astype would cost its own full HBM pass).

    # Packed-row view of the batch: each packed row carries `pack` examples
    # laid out contiguously (row-major), so the reshape below is free.
    # Pad at most pack-1 example rows, and only when needed.
    rows = pl.cdiv(B, pack)
    pad_examples = rows * pack - B
    if pad_examples:
        x = jnp.pad(x, ((0, pad_examples), (0, 0)))
    x_p = x.reshape(rows, pF)                        # lane-dense input view

    # Tile sizing: x tile <= ~4 MiB, rows multiple of 16 (bf16 packing),
    # and >= ~4 grid steps for large batches (v7x megacore).
    row_bytes = pF * x_p.dtype.itemsize
    vmem_cap_rows = max(16, ((4 * 2**20) // row_bytes) // 16 * 16)
    tb = min(block_rows, vmem_cap_rows, _round_up(pl.cdiv(rows, 4), 16))
    tb = max(16, (tb // 16) * 16)
    if tb > rows:
        tb = rows                                    # single full-extent tile

    out = pl.pallas_call(
        _logreg_kernel,
        out_shape=jax.ShapeDtypeStruct((rows, pC), jnp.float32),
        grid_spec=pltpu.PrefetchScalarGridSpec(
            num_scalar_prefetch=0,
            grid=(pl.cdiv(rows, tb),),               # partial last tile masked
            in_specs=[
                pl.BlockSpec((tb, pF), lambda i: (i, 0)),   # streamed x tiles
                pl.BlockSpec((pF, pC), lambda i: (0, 0)),   # resident weight
                pl.BlockSpec((1, pC), lambda i: (0, 0)),    # resident bias
            ],
            out_specs=pl.BlockSpec((tb, pC), lambda i: (i, 0)),
        ),
        compiler_params=pltpu.CompilerParams(
            # Batch tiles are independent -> megacore sharding on v7x.
            dimension_semantics=("parallel",),
            vmem_limit_bytes=32 * 2**20,
        ),
    )(x_p, w_packed, b_packed)

    # Free row-major un-packing; drop padded example rows only if any exist.
    out = out.reshape(rows * pack, n_classes)
    return out[:B] if pad_examples else out


if __name__ == "__main__":
    n_features = 32
    n_classes = 8
    batch = 4

    key = jax.random.PRNGKey(0)
    kx, kw, kb, kx2 = jax.random.split(key, 4)

    # nn.Linear default init: U(-1/sqrt(F), 1/sqrt(F)).
    bound = 1.0 / jnp.sqrt(jnp.float32(n_features))
    weight = jax.random.uniform(kw, (n_classes, n_features),
                                minval=-bound, maxval=bound, dtype=jnp.float32)
    bias = jax.random.uniform(kb, (n_classes,),
                              minval=-bound, maxval=bound, dtype=jnp.float32)

    # One-time parameter packing (parameter-load time, not per forward call).
    w_packed, b_packed = pack_params(weight, bias)

    # References: (a) exact-f32 math on the bf16-quantized operands (what the
    # kernel computes: exact bf16 products, f32 accumulation) and (b) the
    # pure-f32 PyTorch-equivalent model.
    w_q = weight.astype(jnp.bfloat16).astype(jnp.float32)

    def ref_bf16(xx_bf16):
        xx = xx_bf16.astype(jnp.float32)
        z = jnp.dot(xx, w_q.T, precision=jax.lax.Precision.HIGHEST) + bias
        return jax.nn.sigmoid(z)

    def ref_f32(xx_f32):
        z = jnp.dot(xx_f32, weight.T, precision=jax.lax.Precision.HIGHEST) + bias
        return jax.nn.sigmoid(z)

    # Small case matching the module's toy usage.  The producer emits bf16
    # (the recommended streaming dtype); the cast here stands in for that.
    x = jax.random.normal(kx, (batch, n_features), dtype=jnp.float32)
    x_bf16 = x.astype(jnp.bfloat16)
    out = jax.block_until_ready(
        logistic_regression_forward(x_bf16, w_packed, b_packed,
                                     n_classes=n_classes))
    assert out.shape == (batch, n_classes)
    assert jnp.allclose(out, ref_bf16(x_bf16), atol=1e-4, rtol=1e-4)
    assert jnp.allclose(out, ref_f32(x), atol=3e-2, rtol=3e-2)

    # Larger, non-multiple batch to exercise the multi-tile pipelined path
    # (grid >= 4, resident weight, partial last tile, <pack tail padding).
    x2 = jax.random.normal(kx2, (4099, n_features), dtype=jnp.float32)
    x2_bf16 = x2.astype(jnp.bfloat16)
    out2 = jax.block_until_ready(
        logistic_regression_forward(x2_bf16, w_packed, b_packed,
                                     n_classes=n_classes))
    assert out2.shape == (4099, n_classes)
    assert jnp.allclose(out2, ref_bf16(x2_bf16), atol=1e-4, rtol=1e-4)
    assert jnp.allclose(out2, ref_f32(x2), atol=3e-2, rtol=3e-2)

    print("KERNEL_OK")
</pallas_src>

<mosaic_0001>
module attributes {stable_mosaic.version = 11 : i64} {
  func.func @_logreg_kernel(%arg0: i32, %arg1: memref<1x512xbf16, #tpu.memory_space<vmem>>, %arg2: memref<512x128xbf16, #tpu.memory_space<vmem>>, %arg3: memref<1x128xf32, #tpu.memory_space<vmem>>, %arg4: memref<1x128xf32, #tpu.memory_space<vmem>>) attributes {dimension_semantics = [#tpu.dimension_semantics<parallel>], iteration_bounds = array<i64: 1>, scalar_prefetch = 0 : i64, scratch_operands = 0 : i64, tpu.core_type = #tpu.core_type<tc>, window_params = [{transform_indices = @transform_0, window_bounds = array<i64: 1, 512>}, {pipeline_mode = #tpu.pipeline_mode<synchronous>, transform_indices = @transform_1, window_bounds = array<i64: 512, 128>}, {pipeline_mode = #tpu.pipeline_mode<synchronous>, transform_indices = @transform_2, window_bounds = array<i64: 1, 128>}, {transform_indices = @transform_3, window_bounds = array<i64: 1, 128>}]} {
    %c0 = arith.constant 0 : index
    %c0_0 = arith.constant 0 : index
    %0 = vector.load %arg1[%c0, %c0_0] : memref<1x512xbf16, #tpu.memory_space<vmem>>, vector<1x512xbf16>
    %c0_1 = arith.constant 0 : index
    %c0_2 = arith.constant 0 : index
    %1 = vector.load %arg2[%c0_1, %c0_2] : memref<512x128xbf16, #tpu.memory_space<vmem>>, vector<512x128xbf16>
    %cst = arith.constant dense<0.000000e+00> : vector<1x128xf32>
    %2 = tpu.matmul %0, %1, %cst {dimension_numbers = #tpu.dot_dimension_numbers<[1], [0], [0], [1], [0, 0, 1, 1], [], []>} : vector<1x512xbf16>, vector<512x128xbf16>, vector<1x128xf32> -> vector<1x128xf32>
    %c0_3 = arith.constant 0 : index
    %c0_4 = arith.constant 0 : index
    %3 = vector.load %arg3[%c0_3, %c0_4] : memref<1x128xf32, #tpu.memory_space<vmem>>, vector<1x128xf32>
    %4 = arith.addf %2, %3 : vector<1x128xf32>
    %5 = arith.negf %4 : vector<1x128xf32>
    %6 = math.exp %5 : vector<1x128xf32>
    %cst_5 = arith.constant 1.000000e+00 : f32
    %7 = vector.broadcast %cst_5 : f32 to vector<1x128xf32>
    %8 = arith.addf %7, %6 : vector<1x128xf32>
    %9 = arith.divf %7, %8 : vector<1x128xf32>
    %c0_6 = arith.constant 0 : index
    %c0_7 = arith.constant 0 : index
    %10 = vector.load %arg4[%c0_6, %c0_7] : memref<1x128xf32, #tpu.memory_space<vmem>>, vector<1x128xf32>
    tpu.vector_store %arg4[%c0_6, %c0_7], %9 {strides = array<i32>} : memref<1x128xf32, #tpu.memory_space<vmem>>, vector<1x128xf32>,
    return
  }
  func.func @transform_0(%arg0: i32) -> (i32, i32) {
    %c0_i32 = arith.constant 0 : i32
    %c0_i32_0 = arith.constant 0 : i32
    return %arg0, %c0_i32 : i32, i32
  }
  func.func @transform_1(%arg0: i32) -> (i32, i32) {
    %c0_i32 = arith.constant 0 : i32
    %c0_i32_0 = arith.constant 0 : i32
    %c0_i32_1 = arith.constant 0 : i32
    return %c0_i32, %c0_i32_0 : i32, i32
  }
  func.func @transform_2(%arg0: i32) -> (i32, i32) {
    %c0_i32 = arith.constant 0 : i32
    %c0_i32_0 = arith.constant 0 : i32
    %c0_i32_1 = arith.constant 0 : i32
    return %c0_i32, %c0_i32_0 : i32, i32
  }
  func.func @transform_3(%arg0: i32) -> (i32, i32) {
    %c0_i32 = arith.constant 0 : i32
    %c0_i32_0 = arith.constant 0 : i32
    return %arg0, %c0_i32 : i32, i32
  }
}

</mosaic_0001>

<bundles_post_ra>
// kernel: logistic_regression_forward.1
= control target key start
LH: loop header
LB: loop body
LE: loop exit
PB: predicated region body
PF: predicated region fallthrough
CT: control target
= control target key end

     0   :  { %8 = vsyncpa [#allocation3], 0  ;;  %s548_s12 = smov [#allocation2]   ;;  %s584_s0 = inlined_call_operand.vmem [shape: bf16[1,512], index: 0, kind: input, shape index: {}]   ;;  %s585_s1 = inlined_call_operand.hbm [shape: bf16[512,128], index: 1, kind: input, shape index: {}]   ;;  %s586_s2 = inlined_call_operand.vmem [shape: f32[1,128], index: 2, kind: input, shape index: {}]   ;;  %s587_s3 = inlined_call_operand.vmem [shape: f32[1,128], index: 3, kind: output, shape index: {}]  }
   0x1   :  { %s16_s13 = sshll.u32 %s548_s12, 4  ;;  %s17_s13 = int_to_ptr.vmem [resolvable:$true] %s16_s13 }
   0x2   :  { %s534_s14 = scalar_lea.vmem %s17_s13, 4096  ;;  %p539_p1 = scmp.lt.s32.totalorder %s17_s13, %s17_s13 }
   0x3   :  { %p535_p0 = scmp.ne.s32.totalorder %s17_s13, %s534_s14  ;;  %p540_p2 = scmp.lt.s32.totalorder %s534_s14, %s534_s14 }
   0x5   :  { %p541_p3 = por %p540_p2, %p539_p1 }
   0x7   :  { %p542_p4 = pnand %p541_p3, %p535_p0 }
   0x9   :  { %545 = shalt.err (!%p542_p4)
}
   0xa   :  { %s549_s15 = smov 64   ;;  %s550_s16 = smov 4  }
   0xb   :  { %22 = dma.hbm_to_vmem [thread:$0]  %s585_s1, 4096, %s17_s13, [#allocation3], %s549_s15, %s549_s15, %s550_s16  }
   0xc   :  { %546 = dma.done.wait [#allocation3], 4096  }
   0xd   :  { %547 = vsyncadd [#allocation3], 4294963200  ;;  %v490_v0 = vld [vmem:[#allocation2 + $0x78] sm:$0xff]   ;;  %v494_v4 = vld [vmem:[#allocation2 + $0x70] sm:$0xff]   ;;  %v551_v22 = vmov 1966171168   ;;  %v107_v24 = vlaneseq }
   0xe   :  { %v491_v1 = vld [vmem:[#allocation2 + $0xf8] sm:$0xff]   ;;  %442 = vmatprep.subr.bf16.mxu0 %v490_v0  ;;  %v495_v5 = vld [vmem:[#allocation2 + $0xf0] sm:$0xff]   ;;  %v498_v8 = vld [vmem:[#allocation2 + $0x68] sm:$0xff]   ;;  %v105_v23 = vunpack.c.l.s4 %v551_v22 }
   0xf   :  { %v492_v2 = vld [vmem:[#allocation2 + $0x38] sm:$0xff]   ;;  %464 = vmatprep.subr.bf16.mxu1 %v491_v1  ;;  %v496_v6 = vld [vmem:[#allocation2 + $0x30] sm:$0xff]   ;;  %v499_v9 = vld [vmem:[#allocation2 + $0xe8] sm:$0xff]   ;;  %v108_v30 = vshrl.u32 %v107_v24, 7 }
  0x10   :  { %v493_v3 = vld [vmem:[#allocation2 + $0xb8] sm:$0xff]   ;;  %443 = vmatpush3.bf16.msra.mxu0 %v492_v2  ;;  %v497_v7 = vld [vmem:[#allocation2 + $0xb0] sm:$0xff]   ;;  %v500_v10 = vld [vmem:[#allocation2 + $0x28] sm:$0xff]   ;;  %v106_v29 = vunpack.c.0.s8 %v105_v23 }
  0x11   :  { %465 = vmatpush3.bf16.msra.mxu1 %v493_v3  ;;  %444 = vmatprep.subr.bf16.mxu0 %v494_v4  ;;  %v501_v11 = vld [vmem:[#allocation2 + $0xa8] sm:$0xff]   ;;  %v502_v12 = vld [vmem:[#allocation2 + $0x60] sm:$0xff]   ;;  %v506_v16 = vld [vmem:[#allocation2 + $0x58] sm:$0xff]  }
  0x12   :  { %466 = vmatprep.subr.bf16.mxu1 %v495_v5  ;;  %v503_v13 = vld [vmem:[#allocation2 + $0xe0] sm:$0xff]   ;;  %v507_v17 = vld [vmem:[#allocation2 + $0xd8] sm:$0xff]   ;;  %v510_v20 = vld [vmem:[#allocation2 + $0x50] sm:$0xff]   ;;  %v109_v35 = vsub.s32 %v106_v29, %v108_v30 }
  0x13   :  { %v504_v14 = vld [vmem:[#allocation2 + $0x20] sm:$0xff]   ;;  %v508_v18 = vld [vmem:[#allocation2 + $0x18] sm:$0xff]   ;;  %v511_v21 = vld [vmem:[#allocation2 + $0xd0] sm:$0xff]  }
  0x14   :  { %445 = vmatpush3.bf16.msra.mxu0 %v496_v6  ;;  %v505_v15 = vld [vmem:[#allocation2 + $0xa0] sm:$0xff]   ;;  %v509_v19 = vld [vmem:[#allocation2 + $0x98] sm:$0xff]   ;;  %v512_v25 = vld [vmem:[#allocation2 + $0x10] sm:$0xff]  }
  0x15   :  { %467 = vmatpush3.bf16.msra.mxu1 %v497_v7  ;;  %446 = vmatprep.subr.bf16.mxu0 %v498_v8  ;;  %v513_v26 = vld [vmem:[#allocation2 + $0x90] sm:$0xff]   ;;  %v514_v27 = vld [vmem:[#allocation2 + $0x48] sm:$0xff]   ;;  %v518_v33 = vld [vmem:[#allocation2 + $0x40] sm:$0xff]  }
  0x16   :  { %468 = vmatprep.subr.bf16.mxu1 %v499_v9  ;;  %v515_v28 = vld [vmem:[#allocation2 + $0xc8] sm:$0xff]   ;;  %v519_v34 = vld [vmem:[#allocation2 + $0xc0] sm:$0xff]  }
  0x17   :  { %v516_v31 = vld [vmem:[#allocation2 + $0x8] sm:$0xff]   ;;  %v520_v36 = vld [vmem:[#allocation2] sm:$0xff]  }
  0x18   :  { %447 = vmatpush3.bf16.msra.mxu0 %v500_v10  ;;  %v517_v32 = vld [vmem:[#allocation2 + $0x88] sm:$0xff]   ;;  %v521_v37 = vld [vmem:[#allocation2 + $0x80] sm:$0xff]  }
  0x19   :  { %469 = vmatpush3.bf16.msra.mxu1 %v501_v11  ;;  %448 = vmatprep.subr.bf16.mxu0 %v502_v12  ;;  %v408_v38 = vld.sshfl [vmem:[%s584_s0] sm:$0x33 pattern:$0x75316420] }
  0x1a   :  { %470 = vmatprep.subr.bf16.mxu1 %v503_v13  ;;  %v103_v39 = vcombine.high %v408_v38, %v408_v38  ;;  %v110_v40 = vrot.slane %v408_v38, %v109_v35  ;;  %v94_v46 = vld [vmem:[%s586_s2] sm:$0x1] }
  0x1c   :  { %449 = vmatpush3.bf16.msra.mxu0 %v504_v14  ;;  %v117_v41 = vrot.slane %v103_v39, %v109_v35  ;;  %v118_v42 = vcombine.high %v110_v40, %v110_v40 }
  0x1d   :  { %471 = vmatpush3.bf16.msra.mxu1 %v505_v15  ;;  %450 = vmatprep.subr.bf16.mxu0 %v506_v16 }
  0x1e   :  { %472 = vmatprep.subr.bf16.mxu1 %v507_v17  ;;  %348 = vmatprep.mubr.bf16.mxu0 %v117_v41  ;;  %v119_v43 = vcombine.high %v117_v41, %v117_v41 }
  0x20   :  { %451 = vmatpush3.bf16.msra.mxu0 %v508_v18  ;;  %388 = vmatprep.mubr.bf16.mxu1 %v119_v43 }
  0x21   :  { %473 = vmatpush3.bf16.msra.mxu1 %v509_v19  ;;  %452 = vmatprep.subr.bf16.mxu0 %v510_v20 }
  0x22   :  { %474 = vmatprep.subr.bf16.mxu1 %v511_v21 }
  0x24   :  { %453 = vmatpush3.bf16.msra.mxu0 %v512_v25 }
  0x25   :  { %475 = vmatpush3.bf16.msra.mxu1 %v513_v26  ;;  %454 = vmatprep.subr.bf16.mxu0 %v514_v27 }
  0x26   :  { %476 = vmatprep.subr.bf16.mxu1 %v515_v28 }
  0x28   :  { %455 = vmatpush3.bf16.msra.mxu0 %v516_v31 }
  0x29   :  { %477 = vmatpush3.bf16.msra.mxu1 %v517_v32  ;;  %456 = vmatprep.subr.bf16.mxu0 %v518_v33 }
  0x2a   :  { %478 = vmatprep.subr.bf16.mxu1 %v519_v34 }
  0x2c   :  { %457 = vmatpush3.bf16.msra.mxu0 %v520_v36 }
  0x2d   :  { %479 = vmatpush3.bf16.msra.mxu1 %v521_v37 }
  0x2f   :  { %349 = vmatmul.mubr.bf16.vlgmr.msra.gmra.mxu0 %v110_v40 }
  0x30   :  { %389 = vmatmul.mubr.bf16.vlgmr.msra.gmra.mxu1 %v118_v42 }
  0xef   :  { %v458_v44 = vpop.f32.mrf.mxu0 }
  0xf0   :  { %v480_v45 = vpop.f32.mrf.mxu1 }
  0xf1   :  { %v459_v47 = vpop.f32.mrf.mxu0 }
  0xf2   :  { %v460_v48 = vadd.f32 %v459_v47, %v458_v44  ;;  %v481_v49 = vpop.f32.mrf.mxu1 }
  0xf3   :  { %v461_v50 = vpop.f32.mrf.mxu0  ;;  %v482_v52 = vadd.f32 %v481_v49, %v480_v45 }
  0xf4   :  { %v351_v51 = vadd.f32 %v460_v48, %v94_v46  ;;  %v483_v53 = vpop.f32.mrf.mxu1 }
  0xf5   :  { %v462_v54 = vpop.f32.mrf.mxu0 }
  0xf6   :  { %v391_v55 = vadd.f32 %v482_v52, %v351_v51  ;;  %v484_v56 = vpop.f32.mrf.mxu1 }
  0xf8   :  { %v441_v57 = vmul.f32 -1.442695, %v391_v55 }
  0xfa   :  { %522 = vpow2.f32 %v441_v57 }
 0x107   :  { %v523_v58 = vpop.eup %522 }
 0x108   :  { %v399_v59 = vadd.f32 1.0, %v523_v58 }
 0x10a   :  { %524 = vrcp.f32 %v399_v59 }
 0x117   :  { %v525_v60 = vpop.eup %524 }
 0x118   :  { %402 = vst [vmem:[%s587_s3] sm:$0x1] %v525_v60 }
 0x119   :  { %407 = vsyncpa [#allocation3], 1 }

</bundles_post_ra>
